<compile_context>
chip_gen: v7x
topology: tpu7x:2x2x1
jax: 0.10.0
libtpu: 0.0.40
codegen_flags: <defaults>
</compile_context>

<pallas_src>
import jax
import jax.numpy as jnp
from jax.experimental import pallas as pl
from jax.experimental.pallas import tpu as pltpu  # noqa: F401  (TPU backend)


# ---------------------------------------------------------------------------
# Fused Pallas kernel: GCNConv -> ReLU -> (dropout=id) -> GCNConv (mu head)
# ---------------------------------------------------------------------------
def _gae_encoder_kernel(a_ref, x_ref, w1_ref, b1_ref, w2_ref, b2_ref, mu_ref):
    a = a_ref[...]                                              # bf16 [Np, Np]

    # ---- layer 1: h = relu(A_hat @ (X @ W1) + b1) -------------------------
    xw1 = jnp.dot(x_ref[...], w1_ref[...],                      # MXU, f32 acc
                  preferred_element_type=jnp.float32)
    h = jnp.dot(a, xw1.astype(jnp.bfloat16),                    # MXU, f32 acc
                preferred_element_type=jnp.float32)
    h = jnp.maximum(h + b1_ref[...], 0.0)                       # f32 epilogue

    # ---- dropout(p=0.2): identity in eval mode ----------------------------

    # ---- layer 2 (mu head): mu = A_hat @ (h @ W2) + b2 --------------------
    hw2 = jnp.dot(h.astype(jnp.bfloat16), w2_ref[...],
                  preferred_element_type=jnp.float32)
    mu = jnp.dot(a, hw2.astype(jnp.bfloat16),
                 preferred_element_type=jnp.float32)
    mu_ref[...] = (mu + b2_ref[...]).astype(mu_ref.dtype)


# ---------------------------------------------------------------------------
# Graph glue (plain JAX): dense normalized adjacency (PyG gcn_norm semantics)
# ---------------------------------------------------------------------------
def build_normalized_adjacency(edge_index, edge_weight, num_nodes):
    src = edge_index[0]
    dst = edge_index[1]
    loop = jnp.arange(num_nodes, dtype=src.dtype)
    src = jnp.concatenate([src, loop])
    dst = jnp.concatenate([dst, loop])
    w = jnp.concatenate(
        [edge_weight.astype(jnp.float32), jnp.ones((num_nodes,), jnp.float32)]
    )
    deg = jnp.zeros((num_nodes,), jnp.float32).at[dst].add(w)
    dinv = jnp.where(deg > 0.0, jax.lax.rsqrt(deg), 0.0)
    norm = dinv[src] * w * dinv[dst]
    a_hat = jnp.zeros((num_nodes, num_nodes), jnp.float32).at[dst, src].add(norm)
    return a_hat


# ---------------------------------------------------------------------------
# Wrapper: pad to lane-dense 128 multiples, one fused pallas_call, slice back
# ---------------------------------------------------------------------------
def _round_up(x, m):
    return (x + m - 1) // m * m


def gae_forward(params, x, edge_index, edge_attr):
    n, f_in = x.shape
    f_h = params["w1"].shape[1]
    f_out = params["w2_mu"].shape[1]

    n_p = _round_up(n, 128)
    f_in_p = _round_up(f_in, 128)
    f_h_p = _round_up(f_h, 128)
    f_out_p = _round_up(f_out, 128)

    a_hat = build_normalized_adjacency(edge_index, edge_attr, n)

    # zero-pad everything to lane-dense shapes; matmul operands in bf16
    a_p = jnp.zeros((n_p, n_p), jnp.bfloat16).at[:n, :n].set(
        a_hat.astype(jnp.bfloat16))
    x_p = jnp.zeros((n_p, f_in_p), jnp.bfloat16).at[:n, :f_in].set(
        x.astype(jnp.bfloat16))
    w1_p = jnp.zeros((f_in_p, f_h_p), jnp.bfloat16).at[:f_in, :f_h].set(
        params["w1"].astype(jnp.bfloat16))
    b1_p = jnp.zeros((1, f_h_p), jnp.float32).at[:, :f_h].set(
        params["b1"].reshape(1, f_h).astype(jnp.float32))
    w2_p = jnp.zeros((f_h_p, f_out_p), jnp.bfloat16).at[:f_h, :f_out].set(
        params["w2_mu"].astype(jnp.bfloat16))
    b2_p = jnp.zeros((1, f_out_p), jnp.float32).at[:, :f_out].set(
        params["b2_mu"].reshape(1, f_out).astype(jnp.float32))

    mu_p = pl.pallas_call(
        _gae_encoder_kernel,
        out_shape=jax.ShapeDtypeStruct((n_p, f_out_p), jnp.float32),
        in_specs=[
            pl.BlockSpec(a_p.shape, lambda: (0, 0)),
            pl.BlockSpec(x_p.shape, lambda: (0, 0)),
            pl.BlockSpec(w1_p.shape, lambda: (0, 0)),
            pl.BlockSpec(b1_p.shape, lambda: (0, 0)),
            pl.BlockSpec(w2_p.shape, lambda: (0, 0)),
            pl.BlockSpec(b2_p.shape, lambda: (0, 0)),
        ],
        out_specs=pl.BlockSpec((n_p, f_out_p), lambda: (0, 0)),
    )(a_p, x_p, w1_p, b1_p, w2_p, b2_p)

    return mu_p[:n, :f_out]


# ---------------------------------------------------------------------------
# Parameters (glorot init, matching PyG GCNConv defaults) + pure-JAX reference
# ---------------------------------------------------------------------------
def init_gae_params(key, input_dim, hidden_dim, latent_dim):
    def glorot(k, fan_in, fan_out):
        limit = jnp.sqrt(6.0 / (fan_in + fan_out))
        return jax.random.uniform(
            k, (fan_in, fan_out), jnp.float32, minval=-limit, maxval=limit
        )

    k1, k2 = jax.random.split(key, 2)
    return {
        "w1": glorot(k1, input_dim, hidden_dim),
        "b1": jnp.zeros((hidden_dim,), jnp.float32),
        "w2_mu": glorot(k2, hidden_dim, latent_dim),
        "b2_mu": jnp.zeros((latent_dim,), jnp.float32),
    }


def gae_forward_ref(params, x, edge_index, edge_attr):
    a_hat = build_normalized_adjacency(edge_index, edge_attr, x.shape[0])
    h = jnp.maximum(a_hat @ (x @ params["w1"]) + params["b1"], 0.0)
    mu = a_hat @ (h @ params["w2_mu"]) + params["b2_mu"]
    return mu


# ---------------------------------------------------------------------------
if __name__ == "__main__":
    N, E = 64, 128                       # nodes, edges
    INPUT_DIM, HIDDEN_DIM, LATENT_DIM = 16, 32, 8

    key = jax.random.PRNGKey(0)
    kx, ks, ko, kw, kp = jax.random.split(key, 5)

    x = jax.random.normal(kx, (N, INPUT_DIM), jnp.float32)
    src = jax.random.randint(ks, (E,), 0, N, dtype=jnp.int32)
    off = jax.random.randint(ko, (E,), 1, N, dtype=jnp.int32)
    dst = (src + off) % N                           # no self-loops in raw edges
    edge_index = jnp.stack([src, dst], axis=0)      # [2, E]
    edge_attr = jax.random.uniform(kw, (E,), jnp.float32, minval=0.5, maxval=1.5)

    params = init_gae_params(kp, INPUT_DIM, HIDDEN_DIM, LATENT_DIM)

    mu = jax.jit(gae_forward)(params, x, edge_index, edge_attr)
    jax.block_until_ready(mu)

    assert mu.shape == (N, LATENT_DIM)
    assert bool(jnp.all(jnp.isfinite(mu)))

    # numerical sanity vs. pure-JAX f32 reference (bf16 MXU operands -> loose tol)
    mu_ref = gae_forward_ref(params, x, edge_index, edge_attr)
    max_err = float(jnp.max(jnp.abs(mu - mu_ref)))
    assert max_err < 0.15, f"max abs error vs f32 reference too large: {max_err}"

    print("KERNEL_OK")
</pallas_src>

<mosaic_0001>
module attributes {stable_mosaic.version = 11 : i64} {
  func.func private @main(%arg0: i32) attributes {dimension_semantics = [#tpu.dimension_semantics<core_parallel>], iteration_bounds = array<i64: 2>, tpu.core_type = #tpu.core_type<sc_scalar_subcore>, window_params = []} {
    return
  }
}

module attributes {stable_mosaic.version = 11 : i64} {
  func.func private @main(%arg0: i32) attributes {dimension_semantics = [#tpu.dimension_semantics<core_parallel>], iteration_bounds = array<i64: 2>, tpu.core_type = #tpu.core_type<sc_scalar_subcore>, window_params = []} {
    return
  }
}

module attributes {stable_mosaic.version = 11 : i64} {
  func.func @_gae_encoder_kernel(%arg0: memref<128x128xbf16, #tpu.memory_space<vmem>>, %arg1: memref<128x128xbf16, #tpu.memory_space<vmem>>, %arg2: memref<128x128xbf16, #tpu.memory_space<vmem>>, %arg3: memref<1x128xf32, #tpu.memory_space<vmem>>, %arg4: memref<128x128xbf16, #tpu.memory_space<vmem>>, %arg5: memref<1x128xf32, #tpu.memory_space<vmem>>, %arg6: memref<128x128xf32, #tpu.memory_space<vmem>>) attributes {dimension_semantics = [], scalar_prefetch = 0 : i64, scratch_operands = 0 : i64, tpu.core_type = #tpu.core_type<tc>} {
    %c0 = arith.constant 0 : index
    %c0_0 = arith.constant 0 : index
    %0 = vector.load %arg0[%c0, %c0_0] : memref<128x128xbf16, #tpu.memory_space<vmem>>, vector<128x128xbf16>
    %c0_1 = arith.constant 0 : index
    %c0_2 = arith.constant 0 : index
    %1 = vector.load %arg1[%c0_1, %c0_2] : memref<128x128xbf16, #tpu.memory_space<vmem>>, vector<128x128xbf16>
    %c0_3 = arith.constant 0 : index
    %c0_4 = arith.constant 0 : index
    %2 = vector.load %arg2[%c0_3, %c0_4] : memref<128x128xbf16, #tpu.memory_space<vmem>>, vector<128x128xbf16>
    %cst = arith.constant dense<0.000000e+00> : vector<128x128xf32>
    %3 = tpu.matmul %1, %2, %cst {dimension_numbers = #tpu.dot_dimension_numbers<[1], [0], [0], [1], [0, 0, 1, 1], [], []>} : vector<128x128xbf16>, vector<128x128xbf16>, vector<128x128xf32> -> vector<128x128xf32>
    %4 = arith.truncf %3 : vector<128x128xf32> to vector<128x128xbf16>
    %cst_5 = arith.constant dense<0.000000e+00> : vector<128x128xf32>
    %5 = tpu.matmul %0, %4, %cst_5 {dimension_numbers = #tpu.dot_dimension_numbers<[1], [0], [0], [1], [0, 0, 1, 1], [], []>} : vector<128x128xbf16>, vector<128x128xbf16>, vector<128x128xf32> -> vector<128x128xf32>
    %c0_6 = arith.constant 0 : index
    %c0_7 = arith.constant 0 : index
    %6 = vector.load %arg3[%c0_6, %c0_7] : memref<1x128xf32, #tpu.memory_space<vmem>>, vector<1x128xf32>
    %7 = vector.broadcast %6 : vector<1x128xf32> to vector<128x128xf32>
    %8 = arith.addf %5, %7 : vector<128x128xf32>
    %cst_8 = arith.constant 0.000000e+00 : f32
    %9 = vector.broadcast %cst_8 : f32 to vector<128x128xf32>
    %10 = arith.maximumf %8, %9 : vector<128x128xf32>
    %11 = arith.truncf %10 : vector<128x128xf32> to vector<128x128xbf16>
    %c0_9 = arith.constant 0 : index
    %c0_10 = arith.constant 0 : index
    %12 = vector.load %arg4[%c0_9, %c0_10] : memref<128x128xbf16, #tpu.memory_space<vmem>>, vector<128x128xbf16>
    %cst_11 = arith.constant dense<0.000000e+00> : vector<128x128xf32>
    %13 = tpu.matmul %11, %12, %cst_11 {dimension_numbers = #tpu.dot_dimension_numbers<[1], [0], [0], [1], [0, 0, 1, 1], [], []>} : vector<128x128xbf16>, vector<128x128xbf16>, vector<128x128xf32> -> vector<128x128xf32>
    %14 = arith.truncf %13 : vector<128x128xf32> to vector<128x128xbf16>
    %cst_12 = arith.constant dense<0.000000e+00> : vector<128x128xf32>
    %15 = tpu.matmul %0, %14, %cst_12 {dimension_numbers = #tpu.dot_dimension_numbers<[1], [0], [0], [1], [0, 0, 1, 1], [], []>} : vector<128x128xbf16>, vector<128x128xbf16>, vector<128x128xf32> -> vector<128x128xf32>
    %c0_13 = arith.constant 0 : index
    %c0_14 = arith.constant 0 : index
    %16 = vector.load %arg5[%c0_13, %c0_14] : memref<1x128xf32, #tpu.memory_space<vmem>>, vector<1x128xf32>
    %17 = vector.broadcast %16 : vector<1x128xf32> to vector<128x128xf32>
    %18 = arith.addf %15, %17 : vector<128x128xf32>
    %c0_15 = arith.constant 0 : index
    %c0_16 = arith.constant 0 : index
    %19 = vector.load %arg6[%c0_15, %c0_16] : memref<128x128xf32, #tpu.memory_space<vmem>>, vector<128x128xf32>
    tpu.vector_store %arg6[%c0_15, %c0_16], %18 {strides = array<i32>} : memref<128x128xf32, #tpu.memory_space<vmem>>, vector<128x128xf32>,
    return
  }
}

</mosaic_0001>

<bundles_post_ra>
// kernel: gae_forward.1
= control target key start
LH: loop header
LB: loop body
LE: loop exit
PB: predicated region body
PF: predicated region fallthrough
CT: control target
= control target key end

     0   :  { %s1217_s2 = inlined_call_operand.vmem [shape: bf16[128,128], index: 2, kind: input, shape index: {}]   ;;  %s1218_s1 = inlined_call_operand.vmem [shape: bf16[128,128], index: 1, kind: input, shape index: {}]   ;;  %s1219_s0 = inlined_call_operand.vmem [shape: bf16[128,128], index: 0, kind: input, shape index: {}]   ;;  %s1220_s4 = inlined_call_operand.vmem [shape: bf16[128,128], index: 4, kind: input, shape index: {}]   ;;  %s1221_s3 = inlined_call_operand.vmem [shape: f32[1,128], index: 3, kind: input, shape index: {}]   ;;  %s1222_s5 = inlined_call_operand.vmem [shape: f32[1,128], index: 5, kind: input, shape index: {}]   ;;  %s1223_s6 = inlined_call_operand.vmem [shape: f32[128,128], index: 6, kind: output, shape index: {}]  }
   0x1   :  { %v968_v0 = vld [vmem:[%s1217_s2] sm:$0xff]   ;;  %v969_v1 = vld [vmem:[%s1217_s2 + $0x8] sm:$0xff]   ;;  %v970_v2 = vld [vmem:[%s1217_s2 + $0x10] sm:$0xff]  }
   0x2   :  { %840 = vmatprep.subr.bf16.mxu0 %v968_v0  ;;  %v971_v3 = vld [vmem:[%s1217_s2 + $0x18] sm:$0xff]   ;;  %v976_v4 = vld [vmem:[%s1218_s1] sm:$0xff]   ;;  %v973_v6 = vld [vmem:[%s1217_s2 + $0x28] sm:$0xff]  }
   0x3   :  { %841 = vmatpush3.bf16.msra.mxu0 %v968_v0  ;;  %856 = vmatprep.mubr.bf16.mxu0 %v976_v4  ;;  %v972_v5 = vld [vmem:[%s1217_s2 + $0x20] sm:$0xff]   ;;  %v974_v7 = vld [vmem:[%s1217_s2 + $0x30] sm:$0xff]   ;;  %v975_v8 = vld [vmem:[%s1217_s2 + $0x38] sm:$0xff]  }
   0x4   :  { %842 = vmatprep.subr.bf16.mxu0 %v969_v1  ;;  %v977_v9 = vld [vmem:[%s1218_s1 + $0x8] sm:$0xff]   ;;  %v978_v10 = vld [vmem:[%s1218_s1 + $0x10] sm:$0xff]   ;;  %v979_v11 = vld [vmem:[%s1218_s1 + $0x18] sm:$0xff]  }
   0x5   :  { %v980_v12 = vld [vmem:[%s1218_s1 + $0x20] sm:$0xff]   ;;  %v981_v13 = vld [vmem:[%s1218_s1 + $0x28] sm:$0xff]   ;;  %v982_v14 = vld [vmem:[%s1218_s1 + $0x30] sm:$0xff]  }
   0x6   :  { %v983_v15 = vld [vmem:[%s1218_s1 + $0x38] sm:$0xff]   ;;  %v1086_v16 = vld [vmem:[%s1219_s0] sm:$0xff]   ;;  %v993_v18 = vld [vmem:[%s1220_s4 + $0x8] sm:$0xff]  }
   0x7   :  { %843 = vmatpush3.bf16.msra.mxu0 %v969_v1  ;;  %888 = vmatprep.mubr.bf16.mxu1 %v1086_v16  ;;  %v992_v17 = vld [vmem:[%s1220_s4] sm:$0xff]   ;;  %v994_v19 = vld [vmem:[%s1220_s4 + $0x10] sm:$0xff]   ;;  %v995_v20 = vld [vmem:[%s1220_s4 + $0x18] sm:$0xff]  }
   0x8   :  { %844 = vmatprep.subr.bf16.mxu0 %v970_v2  ;;  %v996_v21 = vld [vmem:[%s1220_s4 + $0x20] sm:$0xff]   ;;  %v997_v22 = vld [vmem:[%s1220_s4 + $0x28] sm:$0xff]   ;;  %v1115_v48 = vld [vmem:[%s1219_s0 + $0x10] sm:$0xff]  }
   0x9   :  { %v1110_v47 = vld [vmem:[%s1219_s0 + $0x8] sm:$0xff]   ;;  %v1122_v49 = vld [vmem:[%s1219_s0 + $0x18] sm:$0xff]   ;;  %v1127_v50 = vld [vmem:[%s1219_s0 + $0x20] sm:$0xff]  }
   0xa   :  { %v1134_v51 = vld [vmem:[%s1219_s0 + $0x28] sm:$0xff]   ;;  %v1139_v52 = vld [vmem:[%s1219_s0 + $0x30] sm:$0xff]   ;;  %v1146_v53 = vld [vmem:[%s1219_s0 + $0x38] sm:$0xff]  }
   0xb   :  { %845 = vmatpush3.bf16.msra.mxu0 %v970_v2  ;;  %v998_v54 = vld [vmem:[%s1220_s4 + $0x30] sm:$0xff]   ;;  %v999_v55 = vld [vmem:[%s1220_s4 + $0x38] sm:$0xff]   ;;  %v758_v56 = vld [vmem:[%s1221_s3] ss:$0 sm:$0xff] }
   0xc   :  { %846 = vmatprep.subr.bf16.mxu0 %v971_v3 }
   0xf   :  { %847 = vmatpush3.bf16.msra.mxu0 %v971_v3 }
  0x10   :  { %848 = vmatprep.subr.bf16.mxu0 %v972_v5 }
  0x13   :  { %849 = vmatpush3.bf16.msra.mxu0 %v972_v5 }
  0x14   :  { %850 = vmatprep.subr.bf16.mxu0 %v973_v6 }
  0x17   :  { %851 = vmatpush3.bf16.msra.mxu0 %v973_v6 }
  0x18   :  { %852 = vmatprep.subr.bf16.mxu0 %v974_v7 }
  0x1b   :  { %853 = vmatpush3.bf16.msra.mxu0 %v974_v7 }
  0x1c   :  { %854 = vmatprep.subr.bf16.mxu0 %v975_v8 }
  0x1f   :  { %855 = vmatpush3.bf16.msra.mxu0 %v975_v8 }
  0x20   :  { %904 = vmatprep.subr.bf16.mxu0 %v992_v17 }
  0x22   :  { %857 = vmatmul.mubr.bf16.vlgmr.msra.gmra.mrb[0].mxu0 %v977_v9 }
  0x23   :  { %860 = vmatprep.mubr.bf16.mxu0 %v978_v10  ;;  %905 = vmatpush3.bf16.msra.mxu0 %v992_v17 }
  0x24   :  { %906 = vmatprep.subr.bf16.mxu0 %v993_v18 }
  0x27   :  { %907 = vmatpush3.bf16.msra.mxu0 %v993_v18 }
  0x28   :  { %908 = vmatprep.subr.bf16.mxu0 %v994_v19 }
  0x2a   :  { %861 = vmatmul.mubr.bf16.gmra.mrb[4].mxu0 %v979_v11 }
  0x2b   :  { %864 = vmatprep.mubr.bf16.mxu0 %v980_v12  ;;  %909 = vmatpush3.bf16.msra.mxu0 %v994_v19 }
  0x2c   :  { %910 = vmatprep.subr.bf16.mxu0 %v995_v20 }
  0x2f   :  { %911 = vmatpush3.bf16.msra.mxu0 %v995_v20 }
  0x30   :  { %912 = vmatprep.subr.bf16.mxu0 %v996_v21 }
  0x32   :  { %865 = vmatmul.mubr.bf16.gmra.mrb[8].mxu0 %v981_v13 }
  0x33   :  { %868 = vmatprep.mubr.bf16.mxu0 %v982_v14  ;;  %913 = vmatpush3.bf16.msra.mxu0 %v996_v21 }
  0x34   :  { %914 = vmatprep.subr.bf16.mxu0 %v997_v22 }
  0x37   :  { %915 = vmatpush3.bf16.msra.mxu0 %v997_v22 }
  0x38   :  { %916 = vmatprep.subr.bf16.mxu0 %v998_v54 }
  0x3a   :  { %869 = vmatmul.mubr.bf16.gmra.mrb[12].mxu0 %v983_v15 }
  0x3b   :  { %917 = vmatpush3.bf16.msra.mxu0 %v998_v54 }
  0x3c   :  { %918 = vmatprep.subr.bf16.mxu0 %v999_v55 }
  0x3f   :  { %919 = vmatpush3.bf16.msra.mxu0 %v999_v55 }
  0xf5   :  { %v858_v23 = vpop.f32.mrb[0].mxu0 }
  0xf6   :  { %v202_v24 = vpop.f32.mrb[1].mxu0 }
  0xf7   :  { %v859_v25 = vpop.f32.mrb[2].mxu0 }
  0xf8   :  { %v266_v26 = vpack.c.bf16 %v859_v25, %v858_v23  ;;  %v205_v27 = vpop.f32.mrb[3].mxu0 }
  0xf9   :  { %v265_v28 = vpack.c.bf16 %v205_v27, %v202_v24 }
  0xfb   :  { %872 = vmatprep.subr.bf16.mxu1 %v265_v28 }
  0xfc   :  { %873 = vmatpush3.bf16.msra.mxu1 %v265_v28 }
  0xfd   :  { %v862_v29 = vpop.f32.mrb[4].mxu0  ;;  %874 = vmatprep.subr.bf16.mxu1 %v266_v26 }
  0xfe   :  { %v218_v30 = vpop.f32.mrb[5].mxu0 }
  0xff   :  { %v863_v31 = vpop.f32.mrb[6].mxu0 }
 0x100   :  { %v268_v32 = vpack.c.bf16 %v863_v31, %v862_v29  ;;  %v221_v33 = vpop.f32.mrb[7].mxu0  ;;  %875 = vmatpush3.bf16.msra.mxu1 %v266_v26 }
 0x101   :  { %v267_v34 = vpack.c.bf16 %v221_v33, %v218_v30 }
 0x103   :  { %876 = vmatprep.subr.bf16.mxu1 %v267_v34 }
 0x104   :  { %877 = vmatpush3.bf16.msra.mxu1 %v267_v34 }
 0x105   :  { %v866_v35 = vpop.f32.mrb[8].mxu0  ;;  %878 = vmatprep.subr.bf16.mxu1 %v268_v32 }
 0x106   :  { %v234_v36 = vpop.f32.mrb[9].mxu0 }
 0x107   :  { %v867_v37 = vpop.f32.mrb[10].mxu0 }
 0x108   :  { %v270_v38 = vpack.c.bf16 %v867_v37, %v866_v35  ;;  %v237_v39 = vpop.f32.mrb[11].mxu0  ;;  %879 = vmatpush3.bf16.msra.mxu1 %v268_v32 }
 0x109   :  { %v269_v40 = vpack.c.bf16 %v237_v39, %v234_v36 }
 0x10b   :  { %880 = vmatprep.subr.bf16.mxu1 %v269_v40 }
 0x10c   :  { %881 = vmatpush3.bf16.msra.mxu1 %v269_v40 }
 0x10d   :  { %v870_v41 = vpop.f32.mrb[12].mxu0  ;;  %882 = vmatprep.subr.bf16.mxu1 %v270_v38 }
 0x10e   :  { %v250_v42 = vpop.f32.mrb[13].mxu0 }
 0x10f   :  { %v871_v43 = vpop.f32.mrb[14].mxu0 }
 0x110   :  { %v272_v44 = vpack.c.bf16 %v871_v43, %v870_v41  ;;  %v253_v45 = vpop.f32.mrb[15].mxu0  ;;  %883 = vmatpush3.bf16.msra.mxu1 %v270_v38 }
 0x111   :  { %v271_v46 = vpack.c.bf16 %v253_v45, %v250_v42 }
 0x113   :  { %884 = vmatprep.subr.bf16.mxu1 %v271_v46 }
 0x114   :  { %885 = vmatpush3.bf16.msra.mxu1 %v271_v46 }
 0x115   :  { %886 = vmatprep.subr.bf16.mxu1 %v272_v44 }
 0x118   :  { %887 = vmatpush3.bf16.msra.mxu1 %v272_v44 }
 0x11b   :  { %889 = vmatmul.mubr.bf16.vlgmr.msra.gmra.mrb[0].mxu1 %v1110_v47 }
 0x11c   :  { %892 = vmatprep.mubr.bf16.mxu1 %v1115_v48 }
 0x123   :  { %893 = vmatmul.mubr.bf16.gmra.mrb[4].mxu1 %v1122_v49 }
 0x124   :  { %896 = vmatprep.mubr.bf16.mxu1 %v1127_v50 }
 0x12b   :  { %897 = vmatmul.mubr.bf16.gmra.mrb[8].mxu1 %v1134_v51 }
 0x12c   :  { %900 = vmatprep.mubr.bf16.mxu1 %v1139_v52 }
 0x133   :  { %901 = vmatmul.mubr.bf16.gmra.mrb[12].mxu1 %v1146_v53 }
 0x134   :  { %952 = vmatprep.mubr.bf16.mxu1 %v1086_v16 }
 0x1ee   :  { %v890_v57 = vpop.f32.mrb[0].mxu1 }
 0x1ef   :  { %v371_v58 = vadd.f32 %v890_v57, %v758_v56  ;;  %v362_v59 = vpop.f32.mrb[1].mxu1 }
 0x1f0   :  { %v363_v60 = vadd.f32 %v758_v56, %v362_v59  ;;  %v891_v61 = vpop.f32.mrb[2].mxu1 }
 0x1f1   :  { %v374_v62 = vadd.f32 %v891_v61, %v758_v56  ;;  %v365_v63 = vpop.f32.mrb[3].mxu1  ;;  %v427_v1 = vmax.f32 %v371_v58, 0.0 }
 0x1f2   :  { %v366_v0 = vadd.f32 %v758_v56, %v365_v63  ;;  %v425_v3 = vmax.f32 %v363_v60, 0.0 }
 0x1f3   :  { %v428_v2 = vmax.f32 %v374_v62, 0.0 }
 0x1f4   :  { %v426_v4 = vmax.f32 %v366_v0, 0.0 }
 0x1f5   :  { %v442_v5 = vpack.c.bf16 %v428_v2, %v427_v1 }
 0x1f6   :  { %v441_v6 = vpack.c.bf16 %v426_v4, %v425_v3  ;;  %v894_v7 = vpop.f32.mrb[4].mxu1 }
 0x1f7   :  { %v387_v8 = vadd.f32 %v894_v7, %v758_v56  ;;  %v378_v9 = vpop.f32.mrb[5].mxu1 }
 0x1f8   :  { %v379_v10 = vadd.f32 %v758_v56, %v378_v9  ;;  %v895_v11 = vpop.f32.mrb[6].mxu1  ;;  %920 = vmatprep.mubr.bf16.mxu0 %v441_v6 }
 0x1f9   :  { %v390_v12 = vadd.f32 %v895_v11, %v758_v56  ;;  %v381_v13 = vpop.f32.mrb[7].mxu1  ;;  %921 = vmatmul.mubr.bf16.vlgmr.msra.gmra.mrb[16].mxu0 %v442_v5  ;;  %v431_v15 = vmax.f32 %v387_v8, 0.0 }
 0x1fa   :  { %v382_v14 = vadd.f32 %v758_v56, %v381_v13  ;;  %v429_v17 = vmax.f32 %v379_v10, 0.0 }
 0x1fb   :  { %v432_v16 = vmax.f32 %v390_v12, 0.0 }
 0x1fc   :  { %v430_v18 = vmax.f32 %v382_v14, 0.0 }
 0x1fd   :  { %v444_v19 = vpack.c.bf16 %v432_v16, %v431_v15  ;;  %v775_v16 = vld [vmem:[%s1222_s5] ss:$0 sm:$0xff] }
 0x1fe   :  { %v443_v20 = vpack.c.bf16 %v430_v18, %v429_v17  ;;  %v898_v21 = vpop.f32.mrb[8].mxu1 }
 0x1ff   :  { %v403_v22 = vadd.f32 %v898_v21, %v758_v56  ;;  %v394_v23 = vpop.f32.mrb[9].mxu1 }
 0x200   :  { %v395_v24 = vadd.f32 %v758_v56, %v394_v23  ;;  %v899_v25 = vpop.f32.mrb[10].mxu1  ;;  %924 = vmatprep.mubr.bf16.mxu0 %v443_v20 }
 0x201   :  { %v406_v26 = vadd.f32 %v899_v25, %v758_v56  ;;  %v397_v27 = vpop.f32.mrb[11].mxu1  ;;  %925 = vmatmul.mubr.bf16.gmra.mrb[20].mxu0 %v444_v19  ;;  %v435_v29 = vmax.f32 %v403_v22, 0.0 }
 0x202   :  { %v398_v28 = vadd.f32 %v758_v56, %v397_v27  ;;  %v433_v31 = vmax.f32 %v395_v24, 0.0 }
 0x203   :  { %v436_v30 = vmax.f32 %v406_v26, 0.0 }
 0x204   :  { %v434_v32 = vmax.f32 %v398_v28, 0.0 }
 0x205   :  { %v446_v33 = vpack.c.bf16 %v436_v30, %v435_v29 }
 0x206   :  { %v445_v34 = vpack.c.bf16 %v434_v32, %v433_v31  ;;  %v902_v35 = vpop.f32.mrb[12].mxu1 }
 0x207   :  { %v419_v36 = vadd.f32 %v902_v35, %v758_v56  ;;  %v410_v37 = vpop.f32.mrb[13].mxu1 }
 0x208   :  { %v411_v38 = vadd.f32 %v758_v56, %v410_v37  ;;  %v903_v39 = vpop.f32.mrb[14].mxu1  ;;  %928 = vmatprep.mubr.bf16.mxu0 %v445_v34 }
 0x209   :  { %v422_v40 = vadd.f32 %v903_v39, %v758_v56  ;;  %v413_v41 = vpop.f32.mrb[15].mxu1  ;;  %929 = vmatmul.mubr.bf16.gmra.mrb[24].mxu0 %v446_v33  ;;  %v439_v43 = vmax.f32 %v419_v36, 0.0 }
 0x20a   :  { %v414_v42 = vadd.f32 %v758_v56, %v413_v41  ;;  %v437_v45 = vmax.f32 %v411_v38, 0.0 }
 0x20b   :  { %v440_v44 = vmax.f32 %v422_v40, 0.0 }
 0x20c   :  { %v438_v46 = vmax.f32 %v414_v42, 0.0 }
 0x20d   :  { %v448_v54 = vpack.c.bf16 %v440_v44, %v439_v43 }
 0x20e   :  { %v447_v55 = vpack.c.bf16 %v438_v46, %v437_v45 }
 0x210   :  { %932 = vmatprep.mubr.bf16.mxu0 %v447_v55 }
 0x211   :  { %933 = vmatmul.mubr.bf16.gmra.mrb[28].mxu0 %v448_v54 }
 0x2cc   :  { %v922_v57 = vpop.f32.mrb[16].mxu0 }
 0x2cd   :  { %v547_v58 = vpop.f32.mrb[17].mxu0 }
 0x2ce   :  { %v923_v59 = vpop.f32.mrb[18].mxu0 }
 0x2cf   :  { %v611_v60 = vpack.c.bf16 %v923_v59, %v922_v57  ;;  %v550_v61 = vpop.f32.mrb[19].mxu0 }
 0x2d0   :  { %v610_v62 = vpack.c.bf16 %v550_v61, %v547_v58 }
 0x2d2   :  { %936 = vmatprep.subr.bf16.mxu1 %v610_v62 }
 0x2d3   :  { %937 = vmatpush3.bf16.msra.mxu1 %v610_v62 }
 0x2d4   :  { %v926_v63 = vpop.f32.mrb[20].mxu0  ;;  %938 = vmatprep.subr.bf16.mxu1 %v611_v60 }
 0x2d5   :  { %v563_v0 = vpop.f32.mrb[21].mxu0 }
 0x2d6   :  { %v927_v56 = vpop.f32.mrb[22].mxu0 }
 0x2d7   :  { %v613_v1 = vpack.c.bf16 %v927_v56, %v926_v63  ;;  %v566_v2 = vpop.f32.mrb[23].mxu0  ;;  %939 = vmatpush3.bf16.msra.mxu1 %v611_v60 }
 0x2d8   :  { %v612_v3 = vpack.c.bf16 %v566_v2, %v563_v0 }
 0x2da   :  { %940 = vmatprep.subr.bf16.mxu1 %v612_v3 }
 0x2db   :  { %941 = vmatpush3.bf16.msra.mxu1 %v612_v3 }
 0x2dc   :  { %v930_v4 = vpop.f32.mrb[24].mxu0  ;;  %942 = vmatprep.subr.bf16.mxu1 %v613_v1 }
 0x2dd   :  { %v579_v5 = vpop.f32.mrb[25].mxu0 }
 0x2de   :  { %v931_v6 = vpop.f32.mrb[26].mxu0 }
 0x2df   :  { %v615_v7 = vpack.c.bf16 %v931_v6, %v930_v4  ;;  %v582_v8 = vpop.f32.mrb[27].mxu0  ;;  %943 = vmatpush3.bf16.msra.mxu1 %v613_v1 }
 0x2e0   :  { %v614_v9 = vpack.c.bf16 %v582_v8, %v579_v5 }
 0x2e2   :  { %944 = vmatprep.subr.bf16.mxu1 %v614_v9 }
 0x2e3   :  { %945 = vmatpush3.bf16.msra.mxu1 %v614_v9 }
 0x2e4   :  { %v934_v10 = vpop.f32.mrb[28].mxu0  ;;  %946 = vmatprep.subr.bf16.mxu1 %v615_v7 }
 0x2e5   :  { %v595_v11 = vpop.f32.mrb[29].mxu0 }
 0x2e6   :  { %v935_v12 = vpop.f32.mrb[30].mxu0 }
 0x2e7   :  { %v617_v13 = vpack.c.bf16 %v935_v12, %v934_v10  ;;  %v598_v14 = vpop.f32.mrb[31].mxu0  ;;  %947 = vmatpush3.bf16.msra.mxu1 %v615_v7 }
 0x2e8   :  { %v616_v15 = vpack.c.bf16 %v598_v14, %v595_v11 }
 0x2ea   :  { %948 = vmatprep.subr.bf16.mxu1 %v616_v15 }
 0x2eb   :  { %949 = vmatpush3.bf16.msra.mxu1 %v616_v15 }
 0x2ec   :  { %950 = vmatprep.subr.bf16.mxu1 %v617_v13 }
 0x2ef   :  { %951 = vmatpush3.bf16.msra.mxu1 %v617_v13 }
 0x2f2   :  { %953 = vmatmul.mubr.bf16.vlgmr.msra.gmra.mrb[16].mxu1 %v1110_v47 }
 0x2f3   :  { %956 = vmatprep.mubr.bf16.mxu1 %v1115_v48 }
 0x2fa   :  { %957 = vmatmul.mubr.bf16.gmra.mrb[20].mxu1 %v1122_v49 }
 0x2fb   :  { %960 = vmatprep.mubr.bf16.mxu1 %v1127_v50 }
 0x302   :  { %961 = vmatmul.mubr.bf16.gmra.mrb[24].mxu1 %v1134_v51 }
 0x303   :  { %964 = vmatprep.mubr.bf16.mxu1 %v1139_v52 }
 0x30a   :  { %965 = vmatmul.mubr.bf16.gmra.mrb[28].mxu1 %v1146_v53 }
 0x3c5   :  { %v954_v17 = vpop.f32.mrb[16].mxu1 }
 0x3c6   :  { %v668_v18 = vadd.f32 %v954_v17, %v775_v16  ;;  %v659_v19 = vpop.f32.mrb[17].mxu1 }
 0x3c7   :  { %v660_v47 = vadd.f32 %v775_v16, %v659_v19  ;;  %v955_v20 = vpop.f32.mrb[18].mxu1 }
 0x3c8   :  { %724 = vst [vmem:[%s1223_s6 + $0x10] sm:$0xff] %v668_v18  ;;  %v671_v48 = vadd.f32 %v955_v20, %v775_v16  ;;  %v662_v49 = vpop.f32.mrb[19].mxu1 }
 0x3c9   :  { %722 = vst [vmem:[%s1223_s6] sm:$0xff] %v660_v47  ;;  %v663_v50 = vadd.f32 %v775_v16, %v662_v49 }
 0x3ca   :  { %725 = vst [vmem:[%s1223_s6 + $0x18] sm:$0xff] %v671_v48 }
 0x3cb   :  { %723 = vst [vmem:[%s1223_s6 + $0x8] sm:$0xff] %v663_v50 }
 0x3cd   :  { %v958_v51 = vpop.f32.mrb[20].mxu1 }
 0x3ce   :  { %v684_v52 = vadd.f32 %v958_v51, %v775_v16  ;;  %v675_v53 = vpop.f32.mrb[21].mxu1 }
 0x3cf   :  { %v676_v21 = vadd.f32 %v775_v16, %v675_v53  ;;  %v959_v22 = vpop.f32.mrb[22].mxu1 }
 0x3d0   :  { %728 = vst [vmem:[%s1223_s6 + $0x30] sm:$0xff] %v684_v52  ;;  %v687_v23 = vadd.f32 %v959_v22, %v775_v16  ;;  %v678_v24 = vpop.f32.mrb[23].mxu1 }
 0x3d1   :  { %726 = vst [vmem:[%s1223_s6 + $0x20] sm:$0xff] %v676_v21  ;;  %v679_v25 = vadd.f32 %v775_v16, %v678_v24 }
 0x3d2   :  { %729 = vst [vmem:[%s1223_s6 + $0x38] sm:$0xff] %v687_v23 }
 0x3d3   :  { %727 = vst [vmem:[%s1223_s6 + $0x28] sm:$0xff] %v679_v25 }
 0x3d5   :  { %v962_v26 = vpop.f32.mrb[24].mxu1 }
 0x3d6   :  { %v700_v27 = vadd.f32 %v962_v26, %v775_v16  ;;  %v691_v28 = vpop.f32.mrb[25].mxu1 }
 0x3d7   :  { %v692_v29 = vadd.f32 %v775_v16, %v691_v28  ;;  %v963_v30 = vpop.f32.mrb[26].mxu1 }
 0x3d8   :  { %732 = vst [vmem:[%s1223_s6 + $0x50] sm:$0xff] %v700_v27  ;;  %v703_v31 = vadd.f32 %v963_v30, %v775_v16  ;;  %v694_v32 = vpop.f32.mrb[27].mxu1 }
 0x3d9   :  { %730 = vst [vmem:[%s1223_s6 + $0x40] sm:$0xff] %v692_v29  ;;  %v695_v33 = vadd.f32 %v775_v16, %v694_v32 }
 0x3da   :  { %733 = vst [vmem:[%s1223_s6 + $0x58] sm:$0xff] %v703_v31 }
 0x3db   :  { %731 = vst [vmem:[%s1223_s6 + $0x48] sm:$0xff] %v695_v33 }
 0x3dd   :  { %v966_v34 = vpop.f32.mrb[28].mxu1 }
 0x3de   :  { %v716_v35 = vadd.f32 %v966_v34, %v775_v16  ;;  %v707_v36 = vpop.f32.mrb[29].mxu1 }
 0x3df   :  { %v708_v37 = vadd.f32 %v775_v16, %v707_v36  ;;  %v967_v38 = vpop.f32.mrb[30].mxu1 }
 0x3e0   :  { %736 = vst [vmem:[%s1223_s6 + $0x70] sm:$0xff] %v716_v35  ;;  %v719_v39 = vadd.f32 %v967_v38, %v775_v16  ;;  %v710_v40 = vpop.f32.mrb[31].mxu1 }
 0x3e1   :  { %734 = vst [vmem:[%s1223_s6 + $0x60] sm:$0xff] %v708_v37  ;;  %v711_v41 = vadd.f32 %v775_v16, %v710_v40 }
 0x3e2   :  { %737 = vst [vmem:[%s1223_s6 + $0x78] sm:$0xff] %v719_v39 }
 0x3e3   :  { %735 = vst [vmem:[%s1223_s6 + $0x68] sm:$0xff] %v711_v41 }

</bundles_post_ra>
